<compile_context>
chip_gen: v5e
topology: v5e:2x2
jax: 0.10.0
libtpu: 0.0.40
codegen_flags: <defaults>
</compile_context>

<pallas_src>
import functools

import jax
import jax.numpy as jnp
from jax.experimental import pallas as pl
from jax.experimental.pallas import tpu as pltpu

BN_EPS = 1e-5


def _round_up(n, m):
    return ((n + m - 1) // m) * m


def _encoder_fc_kernel(num_hidden, n_ref, x_ref, *refs):
    # refs = ([w, gamma, beta] * num_hidden, w_last, b_last, out_ref)
    out_ref = refs[-1]
    params = refs[:-1]

    n_real = n_ref[0]                                  # real batch (SMEM scalar)
    inv_n = 1.0 / n_real.astype(jnp.float32)

    batch_p = x_ref.shape[0]
    row = jax.lax.broadcasted_iota(jnp.int32, (batch_p, 1), 0)
    row_ok = row < n_real                              # (batch_p, 1) bool

    h = x_ref[...]                                     # bf16, lane-dense
    idx = 0
    for _ in range(num_hidden):
        w = params[idx][...]                           # (in_p, out_p)  bf16
        g = params[idx + 1][...]                       # (1, out_p)     f32
        be = params[idx + 2][...]                      # (1, out_p)     f32
        idx += 3

        # Linear without bias (bias is cancelled by the BN mean subtraction).
        y = jnp.dot(h, w, preferred_element_type=jnp.float32)

        # Two-pass batch statistics.  Padded batch rows of y are exactly zero
        # (zero x rows / masked activations), so they contribute nothing to
        # the mean sum; the centered values are masked so they contribute
        # nothing to the variance sum either.  Divide by the real batch.
        mean = jnp.sum(y, axis=0, keepdims=True) * inv_n
        yc = jnp.where(row_ok, y - mean, 0.0)
        var = jnp.sum(yc * yc, axis=0, keepdims=True) * inv_n   # biased var

        # Fused BN normalize + ReLU + padded-row mask in a single select.
        scale = g * jax.lax.rsqrt(var + BN_EPS)        # (1, out_p)
        bn = yc * scale + be
        h = jnp.where(jnp.logical_and(row_ok, bn > 0.0), bn, 0.0)
        h = h.astype(jnp.bfloat16)

    # Final Linear (with bias) + Tanh.
    w = params[idx][...]                               # (in_p, lat_p)  bf16
    b = params[idx + 1][...]                           # (1, lat_p)     f32
    y = jnp.dot(h, w, preferred_element_type=jnp.float32) + b
    out_ref[...] = jnp.tanh(y).astype(out_ref.dtype)


def init_encoder_fc_params(key, input_size, hidden_sizes, latent_size):
    """Raw params mimicking nn.Linear / nn.BatchNorm1d defaults.

    Hidden-layer Linear biases are omitted: they are cancelled by the
    BatchNorm mean subtraction and have no effect on the module's output.
    Layout per hidden layer: [W(in,out), gamma(1,out), beta(1,out)];
    final layer: [W(in,latent), b(1,latent)].
    """
    params = []
    prev = input_size
    for hs in hidden_sizes:
        key, kw = jax.random.split(key)
        bound = 1.0 / float(prev) ** 0.5
        w = jax.random.uniform(kw, (prev, hs), jnp.float32, -bound, bound)
        gamma = jnp.ones((1, hs), jnp.float32)     # BatchNorm1d weight default
        beta = jnp.zeros((1, hs), jnp.float32)     # BatchNorm1d bias default
        params += [w, gamma, beta]
        prev = hs
    key, kw, kb = jax.random.split(key, 3)
    bound = 1.0 / float(prev) ** 0.5
    w = jax.random.uniform(kw, (prev, latent_size), jnp.float32, -bound, bound)
    b = jax.random.uniform(kb, (1, latent_size), jnp.float32, -bound, bound)
    params += [w, b]
    return params


def pad_encoder_fc_params(params, input_size, hidden_sizes, latent_size):
    """One-time lane-dense padding + bf16 cast (hoisted out of the call path).

    Zero-padded weight rows/cols and zero-padded beta keep padded feature
    lanes exactly zero through every layer (do not change this invariant).
    """
    in_p = _round_up(input_size, 128)
    hid_p = [_round_up(h, 128) for h in hidden_sizes]
    lat_p = _round_up(latent_size, 128)

    padded = []
    idx = 0
    prev, prev_p = input_size, in_p
    for hs, hp in zip(hidden_sizes, hid_p):
        w, g, be = params[idx:idx + 3]
        idx += 3
        w_p = (jnp.zeros((prev_p, hp), jnp.float32)
               .at[:prev, :hs].set(w).astype(jnp.bfloat16))
        g_p = jnp.ones((1, hp), jnp.float32).at[:, :hs].set(g)
        b_p = jnp.zeros((1, hp), jnp.float32).at[:, :hs].set(be)
        padded += [w_p, g_p, b_p]
        prev, prev_p = hs, hp

    w, b = params[idx], params[idx + 1]
    w_p = (jnp.zeros((prev_p, lat_p), jnp.float32)
           .at[:prev, :latent_size].set(w).astype(jnp.bfloat16))
    b_p = jnp.zeros((1, lat_p), jnp.float32).at[:, :latent_size].set(b)
    padded += [w_p, b_p]
    return tuple(padded)


@functools.partial(jax.jit, static_argnums=(2, 3))
def encoder_fc_forward(x, padded_params, num_hidden, latent_size):
    batch, input_size = x.shape
    in_p = padded_params[0].shape[0]
    lat_p = padded_params[-1].shape[1]

    # bf16 LHS packs 16 sublanes per vreg -> pad batch to a multiple of 16.
    batch_p = _round_up(batch, 16)

    # Only per-call padding is x itself (pre-cast to bf16); fuses under jit.
    x_p = (jnp.zeros((batch_p, in_p), jnp.bfloat16)
           .at[:batch, :input_size].set(x.astype(jnp.bfloat16)))
    n_real = jnp.full((1,), batch, jnp.int32)

    kernel = functools.partial(_encoder_fc_kernel, num_hidden)
    vmem = pltpu.MemorySpace.VMEM
    smem = pltpu.MemorySpace.SMEM

    out_p = pl.pallas_call(
        kernel,
        out_shape=jax.ShapeDtypeStruct((batch_p, lat_p), jnp.float32),
        in_specs=[pl.BlockSpec(memory_space=smem)]
                 + [pl.BlockSpec(memory_space=vmem)
                    for _ in range(1 + len(padded_params))],
        out_specs=pl.BlockSpec(memory_space=vmem),
        compiler_params=pltpu.CompilerParams(
            # Above v5e's 16 MiB / v6e-v7x's 32 MiB default scoped limits,
            # below v7x's 64 MiB physical VMEM.
            vmem_limit_bytes=48 * 1024 * 1024),
    )(n_real, x_p, *padded_params)

    return out_p[:batch, :latent_size]


def encoder_fc_reference(x, params, num_hidden):
    """Plain-JAX reference mirroring the kernel math (bf16 matmul operands,
    f32 accumulation, training-mode BatchNorm with biased two-pass variance)."""
    h = x.astype(jnp.bfloat16)
    idx = 0
    for _ in range(num_hidden):
        w, g, be = params[idx:idx + 3]
        idx += 3
        y = jnp.dot(h, w.astype(jnp.bfloat16), preferred_element_type=jnp.float32)
        mean = jnp.mean(y, axis=0, keepdims=True)
        yc = y - mean
        var = jnp.mean(yc * yc, axis=0, keepdims=True)
        bn = yc * (g * jax.lax.rsqrt(var + BN_EPS)) + be
        h = jnp.maximum(bn, 0.0).astype(jnp.bfloat16)
    w, b = params[idx], params[idx + 1]
    y = jnp.dot(h, w.astype(jnp.bfloat16), preferred_element_type=jnp.float32) + b
    return jnp.tanh(y)


if __name__ == "__main__":
    # Small config consistent with the module's forward:
    # x: (batch, input_size) -> out: (batch, latent_size)
    batch = 8
    input_size = 32
    hidden_sizes = [64, 32]
    latent_size = 16

    key = jax.random.PRNGKey(0)
    key, kx = jax.random.split(key)
    x = jax.random.normal(kx, (batch, input_size), jnp.float32)

    params = init_encoder_fc_params(key, input_size, hidden_sizes, latent_size)
    # One-time padding / bf16 cast, outside the per-call path.
    padded_params = jax.block_until_ready(
        pad_encoder_fc_params(params, input_size, hidden_sizes, latent_size))

    out = encoder_fc_forward(x, padded_params, len(hidden_sizes), latent_size)
    out = jax.block_until_ready(out)

    ref = encoder_fc_reference(x, params, len(hidden_sizes))
    assert out.shape == (batch, latent_size)
    assert jnp.allclose(out, ref, atol=1e-3, rtol=1e-3), "mismatch vs reference"

    print("KERNEL_OK")
</pallas_src>

<mosaic_0001>
module attributes {stable_mosaic.version = 11 : i64} {
  func.func @_encoder_fc_kernel(%arg0: memref<1xi32, #tpu.memory_space<smem>>, %arg1: memref<16x128xbf16, #tpu.memory_space<vmem>>, %arg2: memref<128x128xbf16, #tpu.memory_space<vmem>>, %arg3: memref<1x128xf32, #tpu.memory_space<vmem>>, %arg4: memref<1x128xf32, #tpu.memory_space<vmem>>, %arg5: memref<128x128xbf16, #tpu.memory_space<vmem>>, %arg6: memref<1x128xf32, #tpu.memory_space<vmem>>, %arg7: memref<1x128xf32, #tpu.memory_space<vmem>>, %arg8: memref<128x128xbf16, #tpu.memory_space<vmem>>, %arg9: memref<1x128xf32, #tpu.memory_space<vmem>>, %arg10: memref<16x128xf32, #tpu.memory_space<vmem>>) attributes {dimension_semantics = [], scalar_prefetch = 0 : i64, scratch_operands = 0 : i64, tpu.core_type = #tpu.core_type<tc>} {
    %c0 = arith.constant 0 : index
    %0 = memref.load %arg0[%c0] : memref<1xi32, #tpu.memory_space<smem>>
    %1 = arith.sitofp %0 : i32 to f32
    %cst = arith.constant 1.000000e+00 : f32
    %2 = arith.divf %cst, %1 : f32
    %3 = tpu.iota {dimensions = array<i32: 0>} : vector<16x1xi32>
    %4 = vector.broadcast %0 : i32 to vector<16x1xi32>
    %5 = arith.cmpi slt, %3, %4 : vector<16x1xi32>
    %c0_0 = arith.constant 0 : index
    %c0_1 = arith.constant 0 : index
    %6 = vector.load %arg1[%c0_0, %c0_1] : memref<16x128xbf16, #tpu.memory_space<vmem>>, vector<16x128xbf16>
    %c0_2 = arith.constant 0 : index
    %c0_3 = arith.constant 0 : index
    %7 = vector.load %arg2[%c0_2, %c0_3] : memref<128x128xbf16, #tpu.memory_space<vmem>>, vector<128x128xbf16>
    %c0_4 = arith.constant 0 : index
    %c0_5 = arith.constant 0 : index
    %8 = vector.load %arg3[%c0_4, %c0_5] : memref<1x128xf32, #tpu.memory_space<vmem>>, vector<1x128xf32>
    %c0_6 = arith.constant 0 : index
    %c0_7 = arith.constant 0 : index
    %9 = vector.load %arg4[%c0_6, %c0_7] : memref<1x128xf32, #tpu.memory_space<vmem>>, vector<1x128xf32>
    %cst_8 = arith.constant dense<0.000000e+00> : vector<16x128xf32>
    %10 = tpu.matmul %6, %7, %cst_8 {dimension_numbers = #tpu.dot_dimension_numbers<[1], [0], [0], [1], [0, 0, 1, 1], [], []>} : vector<16x128xbf16>, vector<128x128xbf16>, vector<16x128xf32> -> vector<16x128xf32>
    %cst_9 = arith.constant dense<0.000000e+00> : vector<128xf32>
    %11 = vector.multi_reduction <add>, %10, %cst_9 [0] : vector<16x128xf32> to vector<128xf32>
    %12 = vector.shape_cast %11 : vector<128xf32> to vector<1x128xf32>
    %13 = vector.broadcast %2 : f32 to vector<1x128xf32>
    %14 = arith.mulf %12, %13 : vector<1x128xf32>
    %15 = vector.broadcast %14 : vector<1x128xf32> to vector<16x128xf32>
    %16 = arith.subf %10, %15 : vector<16x128xf32>
    %cst_10 = arith.constant 0.000000e+00 : f32
    %17 = vector.shape_cast %5 : vector<16x1xi1> to vector<16x1xi1>
    %18 = vector.broadcast %17 : vector<16x1xi1> to vector<16x128xi1>
    %19 = vector.broadcast %cst_10 : f32 to vector<16x128xf32>
    %20 = arith.select %18, %16, %19 : vector<16x128xi1>, vector<16x128xf32>
    %21 = arith.mulf %20, %20 : vector<16x128xf32>
    %cst_11 = arith.constant dense<0.000000e+00> : vector<128xf32>
    %22 = vector.multi_reduction <add>, %21, %cst_11 [0] : vector<16x128xf32> to vector<128xf32>
    %23 = vector.shape_cast %22 : vector<128xf32> to vector<1x128xf32>
    %24 = vector.broadcast %2 : f32 to vector<1x128xf32>
    %25 = arith.mulf %23, %24 : vector<1x128xf32>
    %cst_12 = arith.constant 9.99999974E-6 : f32
    %26 = vector.broadcast %cst_12 : f32 to vector<1x128xf32>
    %27 = arith.addf %25, %26 : vector<1x128xf32>
    %28 = math.rsqrt %27 : vector<1x128xf32>
    %29 = arith.mulf %8, %28 : vector<1x128xf32>
    %30 = vector.broadcast %29 : vector<1x128xf32> to vector<16x128xf32>
    %31 = arith.mulf %20, %30 : vector<16x128xf32>
    %32 = vector.broadcast %9 : vector<1x128xf32> to vector<16x128xf32>
    %33 = arith.addf %31, %32 : vector<16x128xf32>
    %cst_13 = arith.constant 0.000000e+00 : f32
    %34 = vector.broadcast %cst_13 : f32 to vector<16x128xf32>
    %35 = arith.cmpf ogt, %33, %34 : vector<16x128xf32>
    %36 = vector.broadcast %5 : vector<16x1xi1> to vector<16x128xi1>
    %37 = arith.andi %36, %35 : vector<16x128xi1>
    %cst_14 = arith.constant 0.000000e+00 : f32
    %38 = vector.broadcast %cst_14 : f32 to vector<16x128xf32>
    %39 = arith.select %37, %33, %38 : vector<16x128xi1>, vector<16x128xf32>
    %40 = arith.truncf %39 : vector<16x128xf32> to vector<16x128xbf16>
    %c0_15 = arith.constant 0 : index
    %c0_16 = arith.constant 0 : index
    %41 = vector.load %arg5[%c0_15, %c0_16] : memref<128x128xbf16, #tpu.memory_space<vmem>>, vector<128x128xbf16>
    %c0_17 = arith.constant 0 : index
    %c0_18 = arith.constant 0 : index
    %42 = vector.load %arg6[%c0_17, %c0_18] : memref<1x128xf32, #tpu.memory_space<vmem>>, vector<1x128xf32>
    %c0_19 = arith.constant 0 : index
    %c0_20 = arith.constant 0 : index
    %43 = vector.load %arg7[%c0_19, %c0_20] : memref<1x128xf32, #tpu.memory_space<vmem>>, vector<1x128xf32>
    %cst_21 = arith.constant dense<0.000000e+00> : vector<16x128xf32>
    %44 = tpu.matmul %40, %41, %cst_21 {dimension_numbers = #tpu.dot_dimension_numbers<[1], [0], [0], [1], [0, 0, 1, 1], [], []>} : vector<16x128xbf16>, vector<128x128xbf16>, vector<16x128xf32> -> vector<16x128xf32>
    %cst_22 = arith.constant dense<0.000000e+00> : vector<128xf32>
    %45 = vector.multi_reduction <add>, %44, %cst_22 [0] : vector<16x128xf32> to vector<128xf32>
    %46 = vector.shape_cast %45 : vector<128xf32> to vector<1x128xf32>
    %47 = vector.broadcast %2 : f32 to vector<1x128xf32>
    %48 = arith.mulf %46, %47 : vector<1x128xf32>
    %49 = vector.broadcast %48 : vector<1x128xf32> to vector<16x128xf32>
    %50 = arith.subf %44, %49 : vector<16x128xf32>
    %cst_23 = arith.constant 0.000000e+00 : f32
    %51 = vector.shape_cast %5 : vector<16x1xi1> to vector<16x1xi1>
    %52 = vector.broadcast %51 : vector<16x1xi1> to vector<16x128xi1>
    %53 = vector.broadcast %cst_23 : f32 to vector<16x128xf32>
    %54 = arith.select %52, %50, %53 : vector<16x128xi1>, vector<16x128xf32>
    %55 = arith.mulf %54, %54 : vector<16x128xf32>
    %cst_24 = arith.constant dense<0.000000e+00> : vector<128xf32>
    %56 = vector.multi_reduction <add>, %55, %cst_24 [0] : vector<16x128xf32> to vector<128xf32>
    %57 = vector.shape_cast %56 : vector<128xf32> to vector<1x128xf32>
    %58 = vector.broadcast %2 : f32 to vector<1x128xf32>
    %59 = arith.mulf %57, %58 : vector<1x128xf32>
    %cst_25 = arith.constant 9.99999974E-6 : f32
    %60 = vector.broadcast %cst_25 : f32 to vector<1x128xf32>
    %61 = arith.addf %59, %60 : vector<1x128xf32>
    %62 = math.rsqrt %61 : vector<1x128xf32>
    %63 = arith.mulf %42, %62 : vector<1x128xf32>
    %64 = vector.broadcast %63 : vector<1x128xf32> to vector<16x128xf32>
    %65 = arith.mulf %54, %64 : vector<16x128xf32>
    %66 = vector.broadcast %43 : vector<1x128xf32> to vector<16x128xf32>
    %67 = arith.addf %65, %66 : vector<16x128xf32>
    %cst_26 = arith.constant 0.000000e+00 : f32
    %68 = vector.broadcast %cst_26 : f32 to vector<16x128xf32>
    %69 = arith.cmpf ogt, %67, %68 : vector<16x128xf32>
    %70 = vector.broadcast %5 : vector<16x1xi1> to vector<16x128xi1>
    %71 = arith.andi %70, %69 : vector<16x128xi1>
    %cst_27 = arith.constant 0.000000e+00 : f32
    %72 = vector.broadcast %cst_27 : f32 to vector<16x128xf32>
    %73 = arith.select %71, %67, %72 : vector<16x128xi1>, vector<16x128xf32>
    %74 = arith.truncf %73 : vector<16x128xf32> to vector<16x128xbf16>
    %c0_28 = arith.constant 0 : index
    %c0_29 = arith.constant 0 : index
    %75 = vector.load %arg8[%c0_28, %c0_29] : memref<128x128xbf16, #tpu.memory_space<vmem>>, vector<128x128xbf16>
    %c0_30 = arith.constant 0 : index
    %c0_31 = arith.constant 0 : index
    %76 = vector.load %arg9[%c0_30, %c0_31] : memref<1x128xf32, #tpu.memory_space<vmem>>, vector<1x128xf32>
    %cst_32 = arith.constant dense<0.000000e+00> : vector<16x128xf32>
    %77 = tpu.matmul %74, %75, %cst_32 {dimension_numbers = #tpu.dot_dimension_numbers<[1], [0], [0], [1], [0, 0, 1, 1], [], []>} : vector<16x128xbf16>, vector<128x128xbf16>, vector<16x128xf32> -> vector<16x128xf32>
    %78 = vector.broadcast %76 : vector<1x128xf32> to vector<16x128xf32>
    %79 = arith.addf %77, %78 : vector<16x128xf32>
    %80 = math.tanh %79 : vector<16x128xf32>
    %c0_33 = arith.constant 0 : index
    %c0_34 = arith.constant 0 : index
    %81 = vector.load %arg10[%c0_33, %c0_34] : memref<16x128xf32, #tpu.memory_space<vmem>>, vector<16x128xf32>
    tpu.vector_store %arg10[%c0_33, %c0_34], %80 {strides = array<i32>} : memref<16x128xf32, #tpu.memory_space<vmem>>, vector<16x128xf32>,
    return
  }
}

</mosaic_0001>

<bundles_post_ra>
// kernel: encoder_fc_forward.1
= control target key start
LH: loop header
LB: loop body
LE: loop exit
PB: predicated region body
PF: predicated region fallthrough
CT: control target
= control target key end

     0   :  { %16 = vsyncpa [#allocation4], 0  ;;  %s830_s0 = inlined_call_operand.<no memory space> [shape: s32[1], index: 0, kind: input, shape index: {}]   ;;  %s831_s1 = inlined_call_operand.vmem [shape: bf16[16,128], index: 1, kind: input, shape index: {}]   ;;  %s832_s2 = inlined_call_operand.hbm [shape: bf16[128,128], index: 2, kind: input, shape index: {}]   ;;  %s833_s3 = inlined_call_operand.vmem [shape: f32[1,128], index: 3, kind: input, shape index: {}]   ;;  %s834_s4 = inlined_call_operand.vmem [shape: f32[1,128], index: 4, kind: input, shape index: {}]   ;;  %s835_s5 = inlined_call_operand.hbm [shape: bf16[128,128], index: 5, kind: input, shape index: {}]   ;;  %s836_s6 = inlined_call_operand.vmem [shape: f32[1,128], index: 6, kind: input, shape index: {}]   ;;  %s837_s7 = inlined_call_operand.vmem [shape: f32[1,128], index: 7, kind: input, shape index: {}]   ;;  %s838_s8 = inlined_call_operand.hbm [shape: bf16[128,128], index: 8, kind: input, shape index: {}]   ;;  %s839_s9 = inlined_call_operand.vmem [shape: f32[1,128], index: 9, kind: input, shape index: {}]   ;;  %s840_s10 = inlined_call_operand.vmem [shape: f32[16,128], index: 10, kind: output, shape index: {}]  }
   0x1   :  { %17 = vsyncpa [#allocation6], 0  ;;  %s43_s15 = sshll.u32 %s835_s5, 4  ;;  %s701_s16 = smov [#allocation5]   ;;  %s44_s15 = int_to_ptr.hbm [resolvable:$true] %s43_s15 }
   0x2   :  { %s45_s17 = sshll.u32 %s701_s16, 4  ;;  %s26_s20 = sshll.u32 %s832_s2, 4  ;;  %s46_s17 = int_to_ptr.vmem [resolvable:$true] %s45_s17  ;;  %s27_s20 = int_to_ptr.hbm [resolvable:$true] %s26_s20 }
   0x3   :  { %s702_s21 = smov 64   ;;  %s703_s22 = smov 4  }
   0x4   :  { %51 = dma.hbm_to_vmem [thread:$0]  %s44_s15, 1024, %s46_s17, [#allocation6], %s702_s21, %s702_s21, %s703_s22  }
   0x5   :  { %s704_s23 = smov [#allocation3]   ;;  %s60_s27 = sshll.u32 %s838_s8, 4  ;;  %s61_s27 = int_to_ptr.hbm [resolvable:$true] %s60_s27 }
   0x6   :  { %s28_s24 = sshll.u32 %s704_s23, 4  ;;  %s705_s5 = smov [#allocation7]   ;;  %s29_s24 = int_to_ptr.vmem [resolvable:$true] %s28_s24 }
   0x7   :  { %34 = dma.hbm_to_vmem [thread:$0]  %s27_s20, 1024, %s29_s24, [#allocation4], %s702_s21, %s702_s21, %s703_s22  }
   0x8   :  { %s62_s28 = sshll.u32 %s705_s5, 4  ;;  %s63_s28 = int_to_ptr.vmem [resolvable:$true] %s62_s28 }
   0x9   :  { %68 = dma.hbm_to_vmem [thread:$0]  %s61_s27, 1024, %s63_s28, [#allocation6], %s702_s21, %s702_s21, %s703_s22  }
   0xa   :  { %697 = dma.done.wait [#allocation4], 1024  }
   0xb   :  { %698 = vsyncadd [#allocation4], 4294966272 }
   0xc   :  { %699 = dma.done.wait [#allocation6], 2048  }
   0xd   :  { %700 = vsyncadd [#allocation6], 4294965248  ;;  %s84_s30 = scvt.s32.f32 %s830_s0  ;;  %v588_v0 = vld [vmem:[#allocation3 + $0x38] sm:$0xff]  ;;  %v587_v2 = vld [vmem:[#allocation3 + $0x30] sm:$0xff]  ;;  %v101_v24 = vlaneseq  ;;  %v104_v35 = vstv %s830_s0 }
   0xe   :  { %181 = vmatpush.bf16.msra.mxu0 %v588_v0  ;;  %v586_v3 = vld [vmem:[#allocation3 + $0x28] sm:$0xff]  ;;  %v585_v6 = vld [vmem:[#allocation3 + $0x20] sm:$0xff]  ;;  %v584_v11 = vld [vmem:[#allocation3 + $0x18] sm:$0xff] }
   0xf   :  { %v85_v1 = vstv %s84_s30  ;;  %v583_v15 = vld [vmem:[#allocation3 + $0x10] sm:$0xff]  ;;  %v582_v17 = vld [vmem:[#allocation3 + $0x8] sm:$0xff]  ;;  %v581_v18 = vld [vmem:[#allocation3] sm:$0xff]  ;;  %v102_v28 = vshrl.u32 %v101_v24, 7 }
  0x10   :  { %615 = vrcp.f32 %v85_v1  ;;  %v97_v7 = vand.u32 2147483648, %v85_v1  ;;  %vm91_vm0 = vweird.f32 %v85_v1  ;;  %v95_v9 = vand.u32 2147483647, %v85_v1  ;;  %v580_v19 = vld [vmem:[%s831_s1] sm:$0xff]  ;;  %v596_v25 = vld [vmem:[#allocation5 + $0x38] sm:$0xff]  ;;  %v595_v29 = vld [vmem:[#allocation5 + $0x30] sm:$0xff] }
  0x11   :  { %317 = vmatpush.bf16.msra.mxu1 %v596_v25  ;;  %v103_v32 = vadd.s32 8, %v102_v28  ;;  %v594_v34 = vld [vmem:[#allocation5 + $0x28] sm:$0xff]  ;;  %vm782_vm4 = vcmp.lt.s32.totalorder %v102_v28, %v104_v35  ;;  %v593_v40 = vld [vmem:[#allocation5 + $0x20] sm:$0xff]  ;;  %v592_v47 = vld [vmem:[#allocation5 + $0x18] sm:$0xff] }
  0x12   :  { %182 = vmatpush.bf16.msra.mxu0 %v587_v2  ;;  %v98_v12 = vor.u32 1.1754944e-38, %v97_v7  ;;  %vm96_vm3 = vcmp.eq.f32.partialorder %v95_v9, 8.507059e+37  ;;  %v591_v49 = vld [vmem:[#allocation5 + $0x10] sm:$0xff]  ;;  %v590_v52 = vld [vmem:[#allocation5 + $0x8] sm:$0xff]  ;;  %v589_v55 = vld [vmem:[#allocation5] sm:$0xff] }
  0x13   :  { %vm786_vm5 = vcmp.lt.s32.totalorder %v103_v32, %v104_v35  ;;  %v125_v2 = vld [vmem:[%s833_s3] sm:$0x1]  ;;  %v600_v32 = vld [vmem:[#allocation7 + $0x18] sm:$0xff] }
  0x14   :  { %v601_v25 = vld [vmem:[#allocation7 + $0x20] sm:$0xff] }
  0x15   :  { %318 = vmatpush.bf16.msra.mxu1 %v595_v29 }
  0x16   :  { %v616_v4 = vpop.eup %615  ;;  %183 = vmatpush.bf16.msra.mxu0 %v586_v3 }
  0x17   :  { %v87_v5 = vmul.f32 %v616_v4, %v85_v1  ;;  %vm92_vm1 = vweird.f32 %v616_v4 }
  0x18   :  { %vm93_vm2 = vmor %vm91_vm0, %vm92_vm1 }
  0x19   :  { %v88_v8 = vsub.f32 1.0, %v87_v5  ;;  %319 = vmatpush.bf16.msra.mxu1 %v594_v34 }
  0x1a   :  { %184 = vmatpush.bf16.msra.mxu0 %v585_v6  ;;  %v612_v6 = vld [vmem:[%s834_s4] ss:$0 sm:$0xff] }
  0x1b   :  { %v89_v10 = vmul.f32 %v616_v4, %v88_v8 }
  0x1d   :  { %v90_v13 = vadd.f32 %v616_v4, %v89_v10  ;;  %320 = vmatpush.bf16.msra.mxu1 %v593_v40 }
  0x1e   :  { %185 = vmatpush.bf16.msra.mxu0 %v584_v11 }
  0x1f   :  { %v94_v14 = vsel %vm93_vm2, %v616_v4, %v90_v13 }
  0x20   :  { %v99_v16 = vsel %vm96_vm3, %v98_v12, %v94_v14 }
  0x21   :  { %605 = vpush %v99_v16  ;;  %321 = vmatpush.bf16.msra.mxu1 %v592_v47  ;;  %v604_v16 = vld [vmem:[#allocation7 + $0x38] sm:$0xff] }
  0x22   :  { %186 = vmatpush.bf16.msra.mxu0 %v583_v15  ;;  %450 = vmatpush.bf16.msra.mxu2 %v604_v16 }
  0x25   :  { %322 = vmatpush.bf16.msra.mxu1 %v591_v49 }
  0x26   :  { %187 = vmatpush.bf16.msra.mxu0 %v582_v17 }
  0x29   :  { %323 = vmatpush.bf16.msra.mxu1 %v590_v52 }
  0x2a   :  { %188 = vmatpush.bf16.msra.mxu0 %v581_v18 }
  0x2d   :  { %189 = vmatmul.bf16.vlgmr.msra.gmra.mxu0 %v580_v19  ;;  %324 = vmatpush.bf16.msra.mxu1 %v589_v55  ;;  %v603_v19 = vld [vmem:[#allocation7 + $0x30] sm:$0xff] }
  0x2e   :  { %451 = vmatpush.bf16.msra.mxu2 %v603_v19 }
  0x52   :  { %s606_s12 = spop %605 }
  0x53   :  { %v776_v33 = vstv %s606_s12 }
  0xaa   :  { %v190_v20 = vpop.f32.mrf.mxu0 }
  0xb2   :  { %v192_v21 = vpop.f32.mrf.mxu0 }
  0xb3   :  { %v195_v22 = vadd.f32 %v192_v21, %v190_v20 }
  0xb5   :  { %v196_v23 = vrot.slane %v195_v22, 4 }
  0xb7   :  { %v197_v26 = vadd.f32 %v196_v23, %v195_v22  ;;  %v602_v22 = vld [vmem:[#allocation7 + $0x28] sm:$0xff] }
  0xb8   :  { %452 = vmatpush.bf16.msra.mxu2 %v602_v22 }
  0xb9   :  { %v198_v27 = vrot.slane %v197_v26, 2 }
  0xbb   :  { %v199_v30 = vadd.f32 %v198_v27, %v197_v26 }
  0xbc   :  { %453 = vmatpush.bf16.msra.mxu2 %v601_v25 }
  0xbd   :  { %v200_v31 = vrot.slane %v199_v30, 1 }
  0xbf   :  { %v201_v36 = vadd.f32 %v200_v31, %v199_v30 }
  0xc0   :  { %454 = vmatpush.bf16.msra.mxu2 %v600_v32 }
  0xc1   :  { %v203_v37 = vmul.f32 %v776_v33, %v201_v36  ;;  %v599_v36 = vld [vmem:[#allocation7 + $0x10] sm:$0xff] }
  0xc3   :  { %v204_v41 = vsub.f32 %v190_v20, %v203_v37  ;;  %v205_v42 = vsub.f32 %v192_v21, %v203_v37 }
  0xc4   :  { %455 = vmatpush.bf16.msra.mxu2 %v599_v36 }
  0xc5   :  { %v210_v43 = vsel %vm782_vm4, %v204_v41, 0.0  ;;  %v211_v44 = vsel %vm786_vm5, %v205_v42, 0.0  ;;  %v598_v41 = vld [vmem:[#allocation7 + $0x8] sm:$0xff] }
  0xc6   :  { %v212_v45 = vmul.f32 %v210_v43, %v210_v43  ;;  %v213_v46 = vmul.f32 %v211_v44, %v211_v44 }
  0xc8   :  { %v214_v48 = vadd.f32 %v213_v46, %v212_v45  ;;  %456 = vmatpush.bf16.msra.mxu2 %v598_v41 }
  0xca   :  { %v215_v50 = vrot.slane %v214_v48, 4 }
  0xcc   :  { %v216_v51 = vadd.f32 %v215_v50, %v214_v48 }
  0xce   :  { %v217_v53 = vrot.slane %v216_v51, 2 }
  0xd0   :  { %v218_v54 = vadd.f32 %v217_v53, %v216_v51  ;;  %v267_v53 = vld [vmem:[%s836_s6] sm:$0x1] }
  0xd2   :  { %v219_v56 = vrot.slane %v218_v54, 1 }
  0xd4   :  { %v220_v57 = vadd.f32 %v219_v56, %v218_v54 }
  0xd6   :  { %v221_v58 = vmul.f32 %v220_v57, %v776_v33 }
  0xd8   :  { %v222_v59 = vadd.f32 1e-05, %v221_v58 }
  0xda   :  { %617 = vrsqrt.f32 %v222_v59  ;;  %vm229_vm7 = vweird.f32 %v222_v59 }
  0xe0   :  { %v618_v60 = vpop.eup %617 }
  0xe1   :  { %v224_v61 = vmul.f32 %v618_v60, %v222_v59  ;;  %vm230_vm6 = vweird.f32 %v618_v60 }
  0xe2   :  { %vm231_vm8 = vmor %vm229_vm7, %vm230_vm6 }
  0xe3   :  { %v225_v62 = vmul.f32 %v618_v60, %v224_v61 }
  0xe5   :  { %v226_v63 = vmul.f32 0.5, %v225_v62 }
  0xe7   :  { %v227_v0 = vsub.f32 1.5, %v226_v63  ;;  %v614_v63 = vld [vmem:[%s839_s9] ss:$0 sm:$0xff] }
  0xe9   :  { %v228_v1 = vmul.f32 %v618_v60, %v227_v0 }
  0xeb   :  { %v232_v3 = vsel %vm231_vm8, %v618_v60, %v228_v1 }
  0xec   :  { %v233_v4 = vmul.f32 %v232_v3, %v125_v2 }
  0xee   :  { %v235_v5 = vperm.slane %v233_v4, 0 }
  0xf0   :  { %v237_v7 = vmul.f32 %v235_v5, %v210_v43  ;;  %v238_v8 = vmul.f32 %v235_v5, %v211_v44  ;;  %v597_v44 = vld [vmem:[#allocation7] sm:$0xff] }
  0xf1   :  { %457 = vmatpush.bf16.msra.mxu2 %v597_v44 }
  0xf2   :  { %v242_v9 = vadd.f32 %v612_v6, %v237_v7  ;;  %v243_v10 = vadd.f32 %v612_v6, %v238_v8 }
  0xf4   :  { %vm244_vm9 = vcmp.gt.f32.partialorder %v242_v9, 0.0  ;;  %vm245_vm10 = vcmp.gt.f32.partialorder %v243_v10, 0.0  ;;  %v543_v11 = vpack.c.bf16 %v243_v10, %v242_v9 }
  0xf5   :  { %vm246_vm11 = vmand %vm782_vm4, %vm244_vm9 }
  0xf6   :  { %vm247_vm12 = vmand %vm786_vm5, %vm245_vm10 }
  0xf7   :  { %vm542_vm13 = vmpackc.low %vm247_vm12, %vm246_vm11 }
  0xf8   :  { %544 = vmatmul.msk.bf16.vlgmr.msra.gmra.mxu1 %vm542_vm13, %v543_v11 }
 0x175   :  { %v326_v12 = vpop.f32.mrf.mxu1 }
 0x17d   :  { %v328_v13 = vpop.f32.mrf.mxu1 }
 0x17e   :  { %v331_v14 = vadd.f32 %v328_v13, %v326_v12 }
 0x180   :  { %v332_v15 = vrot.slane %v331_v14, 4 }
 0x182   :  { %v333_v17 = vadd.f32 %v332_v15, %v331_v14 }
 0x184   :  { %v334_v18 = vrot.slane %v333_v17, 2 }
 0x186   :  { %v335_v20 = vadd.f32 %v334_v18, %v333_v17 }
 0x188   :  { %v336_v21 = vrot.slane %v335_v20, 1 }
 0x18a   :  { %v337_v23 = vadd.f32 %v336_v21, %v335_v20 }
 0x18c   :  { %v338_v24 = vmul.f32 %v337_v23, %v776_v33 }
 0x18e   :  { %v339_v26 = vsub.f32 %v326_v12, %v338_v24  ;;  %v340_v27 = vsub.f32 %v328_v13, %v338_v24 }
 0x190   :  { %v341_v28 = vsel %vm782_vm4, %v339_v26, 0.0  ;;  %v342_v29 = vsel %vm786_vm5, %v340_v27, 0.0 }
 0x191   :  { %v343_v30 = vmul.f32 %v341_v28, %v341_v28  ;;  %v344_v31 = vmul.f32 %v342_v29, %v342_v29 }
 0x193   :  { %v345_v34 = vadd.f32 %v344_v31, %v343_v30 }
 0x195   :  { %v346_v35 = vrot.slane %v345_v34, 4 }
 0x197   :  { %v347_v37 = vadd.f32 %v346_v35, %v345_v34 }
 0x199   :  { %v348_v40 = vrot.slane %v347_v37, 2 }
 0x19b   :  { %v349_v42 = vadd.f32 %v348_v40, %v347_v37 }
 0x19d   :  { %v350_v43 = vrot.slane %v349_v42, 1 }
 0x19f   :  { %v351_v45 = vadd.f32 %v350_v43, %v349_v42 }
 0x1a1   :  { %v352_v46 = vmul.f32 %v351_v45, %v776_v33  ;;  %v613_v33 = vld [vmem:[%s837_s7] ss:$0 sm:$0xff] }
 0x1a3   :  { %v353_v47 = vadd.f32 1e-05, %v352_v46 }
 0x1a5   :  { %619 = vrsqrt.f32 %v353_v47  ;;  %vm360_vm15 = vweird.f32 %v353_v47 }
 0x1ab   :  { %v620_v48 = vpop.eup %619 }
 0x1ac   :  { %v355_v49 = vmul.f32 %v620_v48, %v353_v47  ;;  %vm361_vm14 = vweird.f32 %v620_v48 }
 0x1ad   :  { %vm362_vm0 = vmor %vm360_vm15, %vm361_vm14 }
 0x1ae   :  { %v356_v50 = vmul.f32 %v620_v48, %v355_v49 }
 0x1b0   :  { %v357_v51 = vmul.f32 0.5, %v356_v50 }
 0x1b2   :  { %v358_v52 = vsub.f32 1.5, %v357_v51 }
 0x1b4   :  { %v359_v54 = vmul.f32 %v620_v48, %v358_v52 }
 0x1b6   :  { %v363_v55 = vsel %vm362_vm0, %v620_v48, %v359_v54 }
 0x1b7   :  { %v364_v56 = vmul.f32 %v363_v55, %v267_v53 }
 0x1b9   :  { %v366_v57 = vperm.slane %v364_v56, 0 }
 0x1bb   :  { %v368_v58 = vmul.f32 %v366_v57, %v341_v28  ;;  %v369_v59 = vmul.f32 %v366_v57, %v342_v29 }
 0x1bd   :  { %v374_v60 = vadd.f32 %v613_v33, %v369_v59  ;;  %v373_v61 = vadd.f32 %v613_v33, %v368_v58 }
 0x1bf   :  { %vm375_vm1 = vcmp.gt.f32.partialorder %v373_v61, 0.0  ;;  %vm376_vm2 = vcmp.gt.f32.partialorder %v374_v60, 0.0  ;;  %v578_v62 = vpack.c.bf16 %v374_v60, %v373_v61 }
 0x1c0   :  { %vm377_vm3 = vmand %vm782_vm4, %vm375_vm1 }
 0x1c1   :  { %vm378_vm6 = vmand %vm786_vm5, %vm376_vm2 }
 0x1c2   :  { %vm577_vm7 = vmpackc.low %vm378_vm6, %vm377_vm3 }
 0x1c3   :  { %579 = vmatmul.msk.bf16.vlgmr.msra.gmra.mxu2 %vm577_vm7, %v578_v62 }
 0x246   :  { %v459_v0 = vpop.f32.mrf.mxu2 }
 0x247   :  { %v460_v1 = vadd.f32 %v614_v63, %v459_v0 }
 0x249   :  { %621 = vtanh.f32 %v460_v1 }
 0x24e   :  { %v461_v2 = vpop.f32.mrf.mxu2 }
 0x24f   :  { %v622_v3 = vpop.eup %621  ;;  %v462_v4 = vadd.f32 %v614_v63, %v461_v2 }
 0x250   :  { %466 = vst [vmem:[%s840_s10] sm:$0xff] %v622_v3 }
 0x251   :  { %623 = vtanh.f32 %v462_v4 }
 0x257   :  { %v624_v38 = vpop.eup %623 }
 0x258   :  { %467 = vst [vmem:[%s840_s10 + $0x8] sm:$0xff] %v624_v38 }
 0x259   :  { %472 = vsyncpa [#allocation4], 1 }
 0x25a   :  { %473 = vsyncpa [#allocation6], 1 }

</bundles_post_ra>
